<compile_context>
chip_gen: v7x
topology: tpu7x:2x2x1
jax: 0.10.0
libtpu: 0.0.40
codegen_flags: <defaults>
</compile_context>

<pallas_src>
import functools

import jax
import jax.numpy as jnp
from jax import lax
from jax.experimental import pallas as pl
from jax.experimental.pallas import tpu as pltpu

_INV_SQRT2 = 0.7071067811865476


# ----------------------------------------------------------------------------
# Fused kernel: backbone surrogate + mask + 2-layer GCN neck + mean pool
# ----------------------------------------------------------------------------
def _encoder_fused_kernel(pts_ref, c_ref, ct_ref, wb_ref, bb_ref,
                          w1_ref, b1_ref, w2_ref, b2_ref, out_ref, x_acc_ref,
                          *, points_per_sample, radius_sq):
    p = points_per_sample
    chunk_pts = pts_ref.shape[0]
    spc = chunk_pts // p                      # samples handled by this chunk
    n = c_ref.shape[0]                        # samples / graph anchors
    d = wb_ref.shape[1]                       # backbone descriptor width

    ci = pl.program_id(1)
    nc = pl.num_programs(1)

    # ---- backbone surrogate (this chunk): relu(points @ Wb + bb) ------------
    h = jnp.dot(pts_ref[...], wb_ref[...], preferred_element_type=jnp.float32)
    h = jnp.maximum(h + bb_ref[...], 0.0)                       # (chunk_pts, D)
    # per-sample mean pool: reshape + sublane reduction (no pooling matrix)
    pooled = h.reshape(spc, p, d).sum(axis=1) * (1.0 / p)       # (spc, D)
    start = pl.multiple_of(ci * spc, spc)
    x_acc_ref[pl.ds(start, spc), :] = pooled

    # ---- neck + writeback once all samples of this batch item are pooled ----
    @pl.when(ci == nc - 1)
    def _finalize():
        x = x_acc_ref[...]                                      # (N, D)
        out_ref[:, 0:d] = x                                     # first half now

        # neighbour mask fused in-kernel (squared distance, diagonal off)
        c = c_ref[...]                                          # (N, 3)
        ct = ct_ref[...]                                        # (3, N)
        sq = jnp.zeros((n, n), jnp.float32)
        for k in range(3):                                      # static unroll
            dk = c[:, k:k + 1] - ct[k:k + 1, :]                 # (N,1)-(1,N)
            sq = sq + dk * dk
        row = lax.broadcasted_iota(jnp.int32, (n, n), 0)
        col = lax.broadcasted_iota(jnp.int32, (n, n), 1)
        m = jnp.where((sq <= radius_sq) & (row != col), 1.0, 0.0)

        # GCN neck, star-graph closed form (binary mask, zero diagonal):
        #   c1 = 1/(1+m) = 1 - 0.5 m ; c1^2 = 1 - 0.75 m ; c2 = m / sqrt(2)
        deg = jnp.sum(m, axis=1, keepdims=True)                 # (N, 1)
        z = jnp.dot(x, w1_ref[...], preferred_element_type=jnp.float32)
        s1 = n - 0.5 * deg                                      # sum_k c1
        s2 = deg * _INV_SQRT2                                   # sum_k c2
        s12 = 0.5 * deg * _INV_SQRT2                            # sum_k c1*c2
        q = (jnp.dot(1.0 - 0.75 * m, z, preferred_element_type=jnp.float32)
             + (s12 + s2) * z
             + (s1 + s2) * b1_ref[...]) * (1.0 / n)
        nn = jnp.dot(q, w2_ref[...], preferred_element_type=jnp.float32) + b2_ref[...]
        out_ref[:, d:2 * d] = nn


def _pick_samples_per_chunk(n, p, max_chunk_points):
    # Largest divisor of n whose chunk (spc*p rows) fits the row budget and is
    # sublane (8) aligned; fall back to a single full block.
    for spc in range(n, 0, -1):
        if n % spc == 0 and spc * p <= max_chunk_points and (spc * p) % 8 == 0:
            return spc
    return n


def encoder_forward_pallas(points, centers, w_b, b_b, w1, b1, w2, b2,
                           *, graph_radius, max_chunk_points=4096):
    bsz, n, p, f_in = points.shape
    d = w_b.shape[1]
    npts = n * p
    pts_flat = points.reshape(bsz, npts, f_in)
    centers_t = jnp.swapaxes(centers, 1, 2)                     # (B, 3, N)

    spc = _pick_samples_per_chunk(n, p, max_chunk_points)
    chunk_pts = spc * p
    num_chunks = npts // chunk_pts

    kernel = functools.partial(_encoder_fused_kernel,
                               points_per_sample=p,
                               radius_sq=float(graph_radius) ** 2)
    return pl.pallas_call(
        kernel,
        out_shape=jax.ShapeDtypeStruct((bsz, n, 2 * d), jnp.float32),
        grid_spec=pltpu.PrefetchScalarGridSpec(
            num_scalar_prefetch=0,
            grid=(bsz, num_chunks),
            in_specs=[
                pl.BlockSpec((None, chunk_pts, f_in), lambda b, c: (b, c, 0)),
                pl.BlockSpec((None, n, 3), lambda b, c: (b, 0, 0)),
                pl.BlockSpec((None, 3, n), lambda b, c: (b, 0, 0)),
                pl.BlockSpec((f_in, d), lambda b, c: (0, 0)),
                pl.BlockSpec((1, d), lambda b, c: (0, 0)),
                pl.BlockSpec((d, d), lambda b, c: (0, 0)),
                pl.BlockSpec((1, d), lambda b, c: (0, 0)),
                pl.BlockSpec((d, d), lambda b, c: (0, 0)),
                pl.BlockSpec((1, d), lambda b, c: (0, 0)),
            ],
            out_specs=pl.BlockSpec((None, n, 2 * d), lambda b, c: (b, 0, 0)),
            scratch_shapes=[pltpu.VMEM((n, d), jnp.float32)],
        ),
        compiler_params=pltpu.CompilerParams(
            dimension_semantics=("parallel", "arbitrary"),
            vmem_limit_bytes=32 * 1024 * 1024,
        ),
    )(pts_flat, centers, centers_t, w_b, b_b, w1, b1, w2, b2)


# ----------------------------------------------------------------------------
# Encoder (synthetic, deterministic parameters)
# ----------------------------------------------------------------------------
class EncoderPallas:
    def __init__(self, backbone_outlen=16, point_feat_dim=8, graph_radius=1.5,
                 max_chunk_points=4096):
        self.backbone_outlen = backbone_outlen
        self.desc_len = backbone_outlen * 2           # backbone output width
        self.descriptor_len = backbone_outlen * 4     # after gcn neck concat
        self.graph_radius = float(graph_radius)
        self.max_chunk_points = int(max_chunk_points)

        key = jax.random.PRNGKey(0)
        k1, k2, k3 = jax.random.split(key, 3)
        d, f_in = self.desc_len, point_feat_dim
        self.w_b = jax.random.normal(k1, (f_in, d), jnp.float32) * 0.1
        self.b_b = jnp.zeros((1, d), jnp.float32)
        self.w1 = jax.random.normal(k2, (d, d), jnp.float32) * (1.0 / jnp.sqrt(d))
        self.b1 = jnp.zeros((1, d), jnp.float32)
        self.w2 = jax.random.normal(k3, (d, d), jnp.float32) * (1.0 / jnp.sqrt(d))
        self.b2 = jnp.zeros((1, d), jnp.float32)

    @functools.partial(jax.jit, static_argnums=0)
    def forward_batched(self, points, centers):
        # points: (B, N, P, F), centers: (B, N, 3)
        return encoder_forward_pallas(points, centers, self.w_b, self.b_b,
                                      self.w1, self.b1, self.w2, self.b2,
                                      graph_radius=self.graph_radius,
                                      max_chunk_points=self.max_chunk_points)

    def forward(self, points, centers):
        return self.forward_batched(points[None], centers[None])[0]

    def __call__(self, points, centers, idxs_b, keys_b):
        return self.forward(points, centers), idxs_b, keys_b


# ----------------------------------------------------------------------------
# Pure-JAX reference (dense adjacency formulation) for correctness check
# ----------------------------------------------------------------------------
def _reference_forward(points, centers, params, graph_radius):
    w_b, b_b, w1, b1, w2, b2 = params
    n, p, f_in = points.shape
    h = jnp.maximum(points.reshape(n * p, f_in) @ w_b + b_b, 0.0)
    x = h.reshape(n, p, -1).mean(axis=1)                        # (N, D)
    sq = jnp.sum((centers[:, None, :] - centers[None, :, :]) ** 2, axis=-1)
    m = ((sq <= graph_radius ** 2) & (~jnp.eye(n, dtype=bool))).astype(jnp.float32)
    eye = jnp.eye(n, dtype=jnp.float32)
    a_hat = eye[None, :, :] + m[:, :, None] * eye[:, None, :]   # (G, N, N)
    dinv = 1.0 / jnp.sqrt(a_hat.sum(-1))
    a_norm = a_hat * dinv[:, :, None] * dinv[:, None, :]
    h1 = jnp.einsum("gkj,jd->gkd", a_norm, x @ w1) + b1
    h2 = jnp.einsum("gkj,gjd->gkd", a_norm,
                    jnp.einsum("gkd,de->gke", h1, w2)) + b2
    nn = h2.mean(axis=1)                                        # (G, D)
    return jnp.concatenate([x, nn], axis=1)


if __name__ == "__main__":
    BATCH = 2            # independent encoder invocations (parallel grid axis)
    N_SAMPLES = 8        # strawberries / graph anchors per invocation
    P_POINTS = 16        # points per strawberry point cloud
    F_IN = 8             # per-point input feature dim
    BACKBONE_OUTLEN = 16

    key = jax.random.PRNGKey(0)
    kp, kc = jax.random.split(key)
    points = jax.random.normal(kp, (BATCH, N_SAMPLES, P_POINTS, F_IN), jnp.float32)
    centers = jax.random.uniform(kc, (BATCH, N_SAMPLES, 3), jnp.float32, 0.0, 2.0)
    idxs_b = jnp.arange(N_SAMPLES, dtype=jnp.int32)
    keys_b = [f"berry_{i}" for i in range(N_SAMPLES)]

    enc = EncoderPallas(backbone_outlen=BACKBONE_OUTLEN,
                        point_feat_dim=F_IN, graph_radius=1.5)
    params = (enc.w_b, enc.b_b, enc.w1, enc.b1, enc.w2, enc.b2)

    # batched path (single chunk per invocation)
    desc_b = jax.block_until_ready(enc.forward_batched(points, centers))
    assert desc_b.shape == (BATCH, N_SAMPLES, enc.descriptor_len), desc_b.shape
    assert bool(jnp.all(jnp.isfinite(desc_b)))
    for b in range(BATCH):
        ref = _reference_forward(points[b], centers[b], params, enc.graph_radius)
        assert bool(jnp.allclose(desc_b[b], ref, rtol=1e-3, atol=1e-3)), \
            float(jnp.max(jnp.abs(desc_b[b] - ref)))

    # multi-chunk path (points tiled over the reduction grid axis)
    enc_chunked = EncoderPallas(backbone_outlen=BACKBONE_OUTLEN,
                                point_feat_dim=F_IN, graph_radius=1.5,
                                max_chunk_points=64)
    desc_c = jax.block_until_ready(enc_chunked.forward_batched(points, centers))
    assert bool(jnp.allclose(desc_c, desc_b, rtol=1e-4, atol=1e-4))

    # module-style single-invocation call
    desc_1, idxs_out, keys_out = enc(points[0], centers[0], idxs_b, keys_b)
    desc_1 = jax.block_until_ready(desc_1)
    assert bool(jnp.allclose(desc_1, desc_b[0], rtol=1e-4, atol=1e-4))

    print("KERNEL_OK")
</pallas_src>

<mosaic_0001>
module attributes {stable_mosaic.version = 11 : i64} {
  func.func @_encoder_fused_kernel(%arg0: i32, %arg1: i32, %arg2: memref<1x128x8xf32, #tpu.memory_space<vmem>>, %arg3: memref<1x8x3xf32, #tpu.memory_space<vmem>>, %arg4: memref<1x3x8xf32, #tpu.memory_space<vmem>>, %arg5: memref<8x32xf32, #tpu.memory_space<vmem>>, %arg6: memref<1x32xf32, #tpu.memory_space<vmem>>, %arg7: memref<32x32xf32, #tpu.memory_space<vmem>>, %arg8: memref<1x32xf32, #tpu.memory_space<vmem>>, %arg9: memref<32x32xf32, #tpu.memory_space<vmem>>, %arg10: memref<1x32xf32, #tpu.memory_space<vmem>>, %arg11: memref<1x8x64xf32, #tpu.memory_space<vmem>>, %arg12: memref<8x32xf32, #tpu.memory_space<vmem>>) attributes {dimension_semantics = [#tpu.dimension_semantics<parallel>, #tpu.dimension_semantics<arbitrary>], iteration_bounds = array<i64: 2, 1>, scalar_prefetch = 0 : i64, scratch_operands = 1 : i64, tpu.core_type = #tpu.core_type<tc>, window_params = [{transform_indices = @transform_0, window_bounds = array<i64: 1, 128, 8>}, {transform_indices = @transform_1, window_bounds = array<i64: 1, 8, 3>}, {transform_indices = @transform_2, window_bounds = array<i64: 1, 3, 8>}, {pipeline_mode = #tpu.pipeline_mode<synchronous>, transform_indices = @transform_3, window_bounds = array<i64: 8, 32>}, {pipeline_mode = #tpu.pipeline_mode<synchronous>, transform_indices = @transform_4, window_bounds = array<i64: 1, 32>}, {pipeline_mode = #tpu.pipeline_mode<synchronous>, transform_indices = @transform_5, window_bounds = array<i64: 32, 32>}, {pipeline_mode = #tpu.pipeline_mode<synchronous>, transform_indices = @transform_6, window_bounds = array<i64: 1, 32>}, {pipeline_mode = #tpu.pipeline_mode<synchronous>, transform_indices = @transform_7, window_bounds = array<i64: 32, 32>}, {pipeline_mode = #tpu.pipeline_mode<synchronous>, transform_indices = @transform_8, window_bounds = array<i64: 1, 32>}, {transform_indices = @transform_9, window_bounds = array<i64: 1, 8, 64>}]} {
    %c0 = arith.constant 0 : index
    %c0_0 = arith.constant 0 : index
    %c0_1 = arith.constant 0 : index
    %0 = vector.load %arg2[%c0, %c0_0, %c0_1] : memref<1x128x8xf32, #tpu.memory_space<vmem>>, vector<1x128x8xf32>
    %1 = vector.shape_cast %0 : vector<1x128x8xf32> to vector<128x8xf32>
    %c0_2 = arith.constant 0 : index
    %c0_3 = arith.constant 0 : index
    %2 = vector.load %arg5[%c0_2, %c0_3] : memref<8x32xf32, #tpu.memory_space<vmem>>, vector<8x32xf32>
    %cst = arith.constant dense<0.000000e+00> : vector<128x32xf32>
    %3 = tpu.matmul %1, %2, %cst {dimension_numbers = #tpu.dot_dimension_numbers<[1], [0], [0], [1], [0, 0, 1, 1], [], []>} : vector<128x8xf32>, vector<8x32xf32>, vector<128x32xf32> -> vector<128x32xf32>
    %c0_4 = arith.constant 0 : index
    %c0_5 = arith.constant 0 : index
    %4 = vector.load %arg6[%c0_4, %c0_5] : memref<1x32xf32, #tpu.memory_space<vmem>>, vector<1x32xf32>
    %5 = vector.broadcast %4 : vector<1x32xf32> to vector<128x32xf32>
    %6 = arith.addf %3, %5 : vector<128x32xf32>
    %cst_6 = arith.constant 0.000000e+00 : f32
    %7 = vector.broadcast %cst_6 : f32 to vector<128x32xf32>
    %8 = arith.maximumf %6, %7 : vector<128x32xf32>
    %9 = vector.shape_cast %8 : vector<128x32xf32> to vector<8x16x32xf32>
    %cst_7 = arith.constant dense<0.000000e+00> : vector<8x32xf32>
    %10 = vector.multi_reduction <add>, %9, %cst_7 [1] : vector<8x16x32xf32> to vector<8x32xf32>
    %cst_8 = arith.constant 6.250000e-02 : f32
    %11 = vector.broadcast %cst_8 : f32 to vector<8x32xf32>
    %12 = arith.mulf %10, %11 : vector<8x32xf32>
    %c8_i32 = arith.constant 8 : i32
    %13 = arith.muli %arg1, %c8_i32 : i32
    %14 = tpu.assume_multiple %13, 8 : i32
    %15 = arith.index_cast %14 : i32 to index
    %c0_9 = arith.constant 0 : index
    %16 = vector.load %arg12[%15, %c0_9] : memref<8x32xf32, #tpu.memory_space<vmem>>, vector<8x32xf32>
    tpu.vector_store %arg12[%15, %c0_9], %12 {strides = array<i32>} : memref<8x32xf32, #tpu.memory_space<vmem>>, vector<8x32xf32>,
    %c0_i32 = arith.constant 0 : i32
    %17 = arith.cmpi eq, %arg1, %c0_i32 : i32
    %18 = arith.extui %17 : i1 to i32
    %c0_i32_10 = arith.constant 0 : i32
    %19 = arith.cmpi ne, %18, %c0_i32_10 : i32
    scf.if %19 {
      %c0_11 = arith.constant 0 : index
      %c0_12 = arith.constant 0 : index
      %20 = vector.load %arg12[%c0_11, %c0_12] : memref<8x32xf32, #tpu.memory_space<vmem>>, vector<8x32xf32>
      %c0_13 = arith.constant 0 : index
      %c0_14 = arith.constant 0 : index
      %c0_15 = arith.constant 0 : index
      %21 = vector.load %arg11[%c0_13, %c0_14, %c0_15] : memref<1x8x64xf32, #tpu.memory_space<vmem>>, vector<1x8x32xf32>
      %22 = vector.shape_cast %21 : vector<1x8x32xf32> to vector<8x32xf32>
      %23 = vector.shape_cast %20 : vector<8x32xf32> to vector<1x8x32xf32>
      tpu.vector_store %arg11[%c0_13, %c0_14, %c0_15], %23 {strides = array<i32>} : memref<1x8x64xf32, #tpu.memory_space<vmem>>, vector<1x8x32xf32>,
      %c0_16 = arith.constant 0 : index
      %c0_17 = arith.constant 0 : index
      %c0_18 = arith.constant 0 : index
      %24 = vector.load %arg3[%c0_16, %c0_17, %c0_18] : memref<1x8x3xf32, #tpu.memory_space<vmem>>, vector<1x8x3xf32>
      %25 = vector.shape_cast %24 : vector<1x8x3xf32> to vector<8x3xf32>
      %c0_19 = arith.constant 0 : index
      %c0_20 = arith.constant 0 : index
      %c0_21 = arith.constant 0 : index
      %26 = vector.load %arg4[%c0_19, %c0_20, %c0_21] : memref<1x3x8xf32, #tpu.memory_space<vmem>>, vector<1x3x8xf32>
      %27 = vector.shape_cast %26 : vector<1x3x8xf32> to vector<3x8xf32>
      %cst_22 = arith.constant 0.000000e+00 : f32
      %28 = vector.broadcast %cst_22 : f32 to vector<8x8xf32>
      %29 = vector.extract_strided_slice %25 {offsets = [0, 0], sizes = [8, 1], strides = [1, 1]} : vector<8x3xf32> to vector<8x1xf32>
      %30 = vector.extract_strided_slice %27 {offsets = [0, 0], sizes = [1, 8], strides = [1, 1]} : vector<3x8xf32> to vector<1x8xf32>
      %31 = vector.broadcast %29 : vector<8x1xf32> to vector<8x8xf32>
      %32 = vector.broadcast %30 : vector<1x8xf32> to vector<8x8xf32>
      %33 = arith.subf %31, %32 : vector<8x8xf32>
      %34 = arith.mulf %33, %33 : vector<8x8xf32>
      %35 = arith.addf %28, %34 : vector<8x8xf32>
      %36 = vector.extract_strided_slice %25 {offsets = [0, 1], sizes = [8, 1], strides = [1, 1]} : vector<8x3xf32> to vector<8x1xf32>
      %37 = vector.extract_strided_slice %27 {offsets = [1, 0], sizes = [1, 8], strides = [1, 1]} : vector<3x8xf32> to vector<1x8xf32>
      %38 = vector.broadcast %36 : vector<8x1xf32> to vector<8x8xf32>
      %39 = vector.broadcast %37 : vector<1x8xf32> to vector<8x8xf32>
      %40 = arith.subf %38, %39 : vector<8x8xf32>
      %41 = arith.mulf %40, %40 : vector<8x8xf32>
      %42 = arith.addf %35, %41 : vector<8x8xf32>
      %43 = vector.extract_strided_slice %25 {offsets = [0, 2], sizes = [8, 1], strides = [1, 1]} : vector<8x3xf32> to vector<8x1xf32>
      %44 = vector.extract_strided_slice %27 {offsets = [2, 0], sizes = [1, 8], strides = [1, 1]} : vector<3x8xf32> to vector<1x8xf32>
      %45 = vector.broadcast %43 : vector<8x1xf32> to vector<8x8xf32>
      %46 = vector.broadcast %44 : vector<1x8xf32> to vector<8x8xf32>
      %47 = arith.subf %45, %46 : vector<8x8xf32>
      %48 = arith.mulf %47, %47 : vector<8x8xf32>
      %49 = arith.addf %42, %48 : vector<8x8xf32>
      %50 = tpu.iota {dimensions = array<i32: 0>} : vector<8x8xi32>
      %51 = tpu.iota {dimensions = array<i32: 1>} : vector<8x8xi32>
      %cst_23 = arith.constant 2.250000e+00 : f32
      %52 = vector.broadcast %cst_23 : f32 to vector<8x8xf32>
      %53 = arith.cmpf ole, %49, %52 : vector<8x8xf32>
      %54 = arith.cmpi ne, %50, %51 : vector<8x8xi32>
      %55 = arith.andi %53, %54 : vector<8x8xi1>
      %cst_24 = arith.constant 1.000000e+00 : f32
      %cst_25 = arith.constant 0.000000e+00 : f32
      %56 = vector.broadcast %cst_24 : f32 to vector<8x8xf32>
      %57 = vector.broadcast %cst_25 : f32 to vector<8x8xf32>
      %58 = arith.select %55, %56, %57 : vector<8x8xi1>, vector<8x8xf32>
      %cst_26 = arith.constant dense<0.000000e+00> : vector<8xf32>
      %59 = vector.multi_reduction <add>, %58, %cst_26 [1] : vector<8x8xf32> to vector<8xf32>
      %60 = vector.shape_cast %59 : vector<8xf32> to vector<8x1xf32>
      %c0_27 = arith.constant 0 : index
      %c0_28 = arith.constant 0 : index
      %61 = vector.load %arg7[%c0_27, %c0_28] : memref<32x32xf32, #tpu.memory_space<vmem>>, vector<32x32xf32>
      %cst_29 = arith.constant dense<0.000000e+00> : vector<8x32xf32>
      %62 = tpu.matmul %20, %61, %cst_29 {dimension_numbers = #tpu.dot_dimension_numbers<[1], [0], [0], [1], [0, 0, 1, 1], [], []>} : vector<8x32xf32>, vector<32x32xf32>, vector<8x32xf32> -> vector<8x32xf32>
      %cst_30 = arith.constant 5.000000e-01 : f32
      %63 = vector.broadcast %cst_30 : f32 to vector<8x1xf32>
      %64 = arith.mulf %63, %60 : vector<8x1xf32>
      %cst_31 = arith.constant 8.000000e+00 : f32
      %65 = vector.broadcast %cst_31 : f32 to vector<8x1xf32>
      %66 = arith.subf %65, %64 : vector<8x1xf32>
      %cst_32 = arith.constant 0.707106769 : f32
      %67 = vector.broadcast %cst_32 : f32 to vector<8x1xf32>
      %68 = arith.mulf %60, %67 : vector<8x1xf32>
      %cst_33 = arith.constant 5.000000e-01 : f32
      %69 = vector.broadcast %cst_33 : f32 to vector<8x1xf32>
      %70 = arith.mulf %69, %60 : vector<8x1xf32>
      %cst_34 = arith.constant 0.707106769 : f32
      %71 = vector.broadcast %cst_34 : f32 to vector<8x1xf32>
      %72 = arith.mulf %70, %71 : vector<8x1xf32>
      %cst_35 = arith.constant 7.500000e-01 : f32
      %73 = vector.broadcast %cst_35 : f32 to vector<8x8xf32>
      %74 = arith.mulf %73, %58 : vector<8x8xf32>
      %cst_36 = arith.constant 1.000000e+00 : f32
      %75 = vector.broadcast %cst_36 : f32 to vector<8x8xf32>
      %76 = arith.subf %75, %74 : vector<8x8xf32>
      %cst_37 = arith.constant dense<0.000000e+00> : vector<8x32xf32>
      %77 = tpu.matmul %76, %62, %cst_37 {dimension_numbers = #tpu.dot_dimension_numbers<[1], [0], [0], [1], [0, 0, 1, 1], [], []>} : vector<8x8xf32>, vector<8x32xf32>, vector<8x32xf32> -> vector<8x32xf32>
      %78 = arith.addf %72, %68 : vector<8x1xf32>
      %79 = vector.broadcast %78 : vector<8x1xf32> to vector<8x32xf32>
      %80 = arith.mulf %79, %62 : vector<8x32xf32>
      %81 = arith.addf %77, %80 : vector<8x32xf32>
      %82 = arith.addf %66, %68 : vector<8x1xf32>
      %c0_38 = arith.constant 0 : index
      %c0_39 = arith.constant 0 : index
      %83 = vector.load %arg8[%c0_38, %c0_39] : memref<1x32xf32, #tpu.memory_space<vmem>>, vector<1x32xf32>
      %84 = vector.broadcast %82 : vector<8x1xf32> to vector<8x32xf32>
      %85 = vector.broadcast %83 : vector<1x32xf32> to vector<8x32xf32>
      %86 = arith.mulf %84, %85 : vector<8x32xf32>
      %87 = arith.addf %81, %86 : vector<8x32xf32>
      %cst_40 = arith.constant 1.250000e-01 : f32
      %88 = vector.broadcast %cst_40 : f32 to vector<8x32xf32>
      %89 = arith.mulf %87, %88 : vector<8x32xf32>
      %c0_41 = arith.constant 0 : index
      %c0_42 = arith.constant 0 : index
      %90 = vector.load %arg9[%c0_41, %c0_42] : memref<32x32xf32, #tpu.memory_space<vmem>>, vector<32x32xf32>
      %cst_43 = arith.constant dense<0.000000e+00> : vector<8x32xf32>
      %91 = tpu.matmul %89, %90, %cst_43 {dimension_numbers = #tpu.dot_dimension_numbers<[1], [0], [0], [1], [0, 0, 1, 1], [], []>} : vector<8x32xf32>, vector<32x32xf32>, vector<8x32xf32> -> vector<8x32xf32>
      %c0_44 = arith.constant 0 : index
      %c0_45 = arith.constant 0 : index
      %92 = vector.load %arg10[%c0_44, %c0_45] : memref<1x32xf32, #tpu.memory_space<vmem>>, vector<1x32xf32>
      %93 = vector.broadcast %92 : vector<1x32xf32> to vector<8x32xf32>
      %94 = arith.addf %91, %93 : vector<8x32xf32>
      %c0_46 = arith.constant 0 : index
      %c0_47 = arith.constant 0 : index
      %c32 = arith.constant 32 : index
      %95 = vector.load %arg11[%c0_46, %c0_47, %c32] : memref<1x8x64xf32, #tpu.memory_space<vmem>>, vector<1x8x32xf32>
      %96 = vector.shape_cast %95 : vector<1x8x32xf32> to vector<8x32xf32>
      %97 = vector.shape_cast %94 : vector<8x32xf32> to vector<1x8x32xf32>
      tpu.vector_store %arg11[%c0_46, %c0_47, %c32], %97 {strides = array<i32>} : memref<1x8x64xf32, #tpu.memory_space<vmem>>, vector<1x8x32xf32>,
    } else {
    }
    return
  }
  func.func @transform_0(%arg0: i32, %arg1: i32) -> (i32, i32, i32) {
    %c0_i32 = arith.constant 0 : i32
    %c0_i32_0 = arith.constant 0 : i32
    return %arg0, %arg1, %c0_i32 : i32, i32, i32
  }
  func.func @transform_1(%arg0: i32, %arg1: i32) -> (i32, i32, i32) {
    %c0_i32 = arith.constant 0 : i32
    %c0_i32_0 = arith.constant 0 : i32
    %c0_i32_1 = arith.constant 0 : i32
    return %arg0, %c0_i32, %c0_i32_0 : i32, i32, i32
  }
  func.func @transform_2(%arg0: i32, %arg1: i32) -> (i32, i32, i32) {
    %c0_i32 = arith.constant 0 : i32
    %c0_i32_0 = arith.constant 0 : i32
    %c0_i32_1 = arith.constant 0 : i32
    return %arg0, %c0_i32, %c0_i32_0 : i32, i32, i32
  }
  func.func @transform_3(%arg0: i32, %arg1: i32) -> (i32, i32) {
    %c0_i32 = arith.constant 0 : i32
    %c0_i32_0 = arith.constant 0 : i32
    %c0_i32_1 = arith.constant 0 : i32
    return %c0_i32, %c0_i32_0 : i32, i32
  }
  func.func @transform_4(%arg0: i32, %arg1: i32) -> (i32, i32) {
    %c0_i32 = arith.constant 0 : i32
    %c0_i32_0 = arith.constant 0 : i32
    %c0_i32_1 = arith.constant 0 : i32
    return %c0_i32, %c0_i32_0 : i32, i32
  }
  func.func @transform_5(%arg0: i32, %arg1: i32) -> (i32, i32) {
    %c0_i32 = arith.constant 0 : i32
    %c0_i32_0 = arith.constant 0 : i32
    %c0_i32_1 = arith.constant 0 : i32
    return %c0_i32, %c0_i32_0 : i32, i32
  }
  func.func @transform_6(%arg0: i32, %arg1: i32) -> (i32, i32) {
    %c0_i32 = arith.constant 0 : i32
    %c0_i32_0 = arith.constant 0 : i32
    %c0_i32_1 = arith.constant 0 : i32
    return %c0_i32, %c0_i32_0 : i32, i32
  }
  func.func @transform_7(%arg0: i32, %arg1: i32) -> (i32, i32) {
    %c0_i32 = arith.constant 0 : i32
    %c0_i32_0 = arith.constant 0 : i32
    %c0_i32_1 = arith.constant 0 : i32
    return %c0_i32, %c0_i32_0 : i32, i32
  }
  func.func @transform_8(%arg0: i32, %arg1: i32) -> (i32, i32) {
    %c0_i32 = arith.constant 0 : i32
    %c0_i32_0 = arith.constant 0 : i32
    %c0_i32_1 = arith.constant 0 : i32
    return %c0_i32, %c0_i32_0 : i32, i32
  }
  func.func @transform_9(%arg0: i32, %arg1: i32) -> (i32, i32, i32) {
    %c0_i32 = arith.constant 0 : i32
    %c0_i32_0 = arith.constant 0 : i32
    %c0_i32_1 = arith.constant 0 : i32
    return %arg0, %c0_i32, %c0_i32_0 : i32, i32, i32
  }
}

</mosaic_0001>

<bundles_post_ra>
// kernel: forward_batched.1
= control target key start
LH: loop header
LB: loop body
LE: loop exit
PB: predicated region body
PF: predicated region fallthrough
CT: control target
= control target key end

     0   :  { %14 = vsyncpa [#allocation4], 0  ;;  %s1755_s0 = inlined_call_operand.vmem [shape: f32[2,128,8], index: 0, kind: input, shape index: {}]   ;;  %s1756_s1 = inlined_call_operand.vmem [shape: f32[2,8,3], index: 1, kind: input, shape index: {}]   ;;  %s1757_s2 = inlined_call_operand.vmem [shape: f32[2,3,8], index: 2, kind: input, shape index: {}]   ;;  %s1758_s3 = inlined_call_operand.vmem [shape: f32[8,32], index: 3, kind: input, shape index: {}]   ;;  %s1759_s4 = inlined_call_operand.vmem [shape: f32[1,32], index: 4, kind: input, shape index: {}, may-alias: {4,6,8}]   ;;  %s1760_s5 = inlined_call_operand.vmem [shape: f32[32,32], index: 5, kind: input, shape index: {}]   ;;  %s1761_s6 = inlined_call_operand.vmem [shape: f32[1,32], index: 6, kind: input, shape index: {}, may-alias: {4,6,8}]   ;;  %s1762_s7 = inlined_call_operand.vmem [shape: f32[32,32], index: 7, kind: input, shape index: {}]   ;;  %s1763_s8 = inlined_call_operand.vmem [shape: f32[1,32], index: 8, kind: input, shape index: {}, may-alias: {4,6,8}]   ;;  %s1764_s9 = inlined_call_operand.hbm [shape: f32[2,8,64], index: 9, kind: output, shape index: {}]  }
   0x1   :  { %16 = vsyncpa [#allocation4 + $0x1], 0  ;;  %s1496_s30 = smov 0   ;;  %s1498_s10 = smov 0  }
   0x2   :  { %s1500_s11 = smov 0   ;;  %s1502_s12 = smov 0  }
   0x3   :  { %s1504_s13 = smov 0   ;;  %s1506_s14 = smov 0  }
   0x4 LB: > { %s1159_s15 = sadd.s32 4294967295, %s1436_s14   ;;  %s1160_s16 = sadd.s32 4294967294, %s1436_s14   ;;  %s1436_s14 = sphi %s1506_s14, %s22_s14   ;;  %s1432_s13 = sphi %s1504_s13, %s1771_s13   ;;  %s1428_s12 = sphi %s1502_s12, %s1770_s12   ;;  %s1424_s11 = sphi %s1500_s11, %s1769_s11   ;;  %s1420_s10 = sphi %s1498_s10, %s1768_s10   ;;  %s1416_s30 = sphi %s1496_s30, %s1767_s30  }
   0x5   : > { %s34_s17 = sadd.s32 1, %s1432_s13  ;;  %s247_s18 = sadd.s32 1, %s1424_s11 }
   0x6   : > { %p36_p0 = scmp.ge.s32.totalorder %s34_s17, 2  ;;  %p257_p1 = scmp.ne.s32.totalorder %s1424_s11, %s1420_s10 }
   0x7   : > { %p258_p2 = scmp.eq.s32.totalorder %s1159_s15, 1  ;;  %p263_p3 = scmp.ne.s32.totalorder %s1420_s10, %s1416_s30 }
   0x8   : > { %s1773_s17 = smov (%p36_p0, %s34_s17), 0  ;;  %p264_p5 = scmp.eq.s32.totalorder %s1160_s16, 1 }
   0x9   : > { %p1536_p4 = por %p258_p2, %p257_p1  ;;  %s244_s20 = ssub.s32 %s1432_s13, %s1773_s17 }
   0xa   : > { %p1163_p6 = scmp.ge.s32.totalorder %s1436_s14, 1  ;;  %p245_p7 = scmp.eq.s32.totalorder %s244_s20, 0 }
   0xb   : > { %p1543_p8 = por %p264_p5, %p263_p3  ;;  %p327_p9 = scmp.lt.s32.totalorder %s1436_s14, 3 }
   0xc   : > { %s1549_s22 = scalar_select %p245_p7, %s1424_s11, %s247_s18  }
   0xd   : > { %p328_p10 = pnand %p1163_p6, %p327_p9 }
   0xe   : > { %v409_v0 = vld [vmem:[%s1758_s3] sm:$0xff] (!%p328_p10)  ;;  %p376_p11 = scmp.lt.s32.totalorder (!%p328_p10), %s1428_s12, 1  ;;  %v1438_v1 = vmov (!%p328_p10), 0   ;;  %v1439_v2 = vmov (!%p328_p10), 2   ;;  %vm417_vm0 = vcmask (!%p328_p10), 64512   ;;  %v1440_v15 = vmov (!%p328_p10), 1  }
   0xf   : > { %331 = sbr.rel (%p328_p10) target bundleno = 1068 (0x42c), region = 56  ;;  %1225 = vmatprep.subr.mxu0 (!%p328_p10), %v409_v0  ;;  %1290 = vmatprep.subr.mxu1 (!%p328_p10), %v409_v0  ;;  %v787_v21 = vld [vmem:[%s1760_s5] sm:$0xff] (!%p328_p10)  ;;  %v788_v22 = vld [vmem:[%s1760_s5 + $0x8] sm:$0xff] (!%p328_p10)  ;;  %v789_v24 = vld [vmem:[%s1760_s5 + $0x10] sm:$0xff] (!%p328_p10)  ;;  %v1441_v26 = vmov (!%p328_p10), 0.0|0.0   ;;  %vm1442_vm1 = vmmov (!%p328_p10), 0   ;;  %v747_v29 = vlaneseq (!%p328_p10) }
  0x10   : > { %1226 = vmatpush3.msra.mxu0 (!%p328_p10), %v409_v0  ;;  %1291 = vmatpush3.msra.mxu1 (!%p328_p10), %v409_v0  ;;  %v1279_v23 = vpack.c.bf16 (!%p328_p10), %v788_v22, %v787_v21  ;;  %v790_v25 = vld [vmem:[%s1760_s5 + $0x18] sm:$0xff] (!%p328_p10)  ;;  %v1443_v27 = vmov (!%p328_p10), 0.0   ;;  %v1629_v52 = vld [vmem:[%s1759_s4] ss:$0 sm:$0xff] (!%p328_p10)  ;;  %vm627_vm5 = vcmask (!%p328_p10), 261120   ;;  %vm717_vm6 = vcmask (!%p328_p10), 1041409  }
  0x11   : > { %1354 = vset.pattern.permute.xlu0 (!%p328_p10), %v1438_v1  ;;  %1356 = vset.pattern.permute.xlu1 (!%p328_p10), %v1439_v2  ;;  %v1282_v28 = vpack.c.bf16 (!%p328_p10), %v790_v25, %v789_v24  ;;  %v748_v31 = vshrl.u32 (!%p328_p10), %v747_v29, 7  ;;  %v779_v47 = vand.u32 (!%p328_p10), 127, %v747_v29  ;;  %vm719_vm7 = vcmask (!%p328_p10), 1042434   ;;  %s372_s27 = sand.u32 (!%p328_p10), 1, %s1420_s10   ;;  %s1192_s23 = sshll.u32 (!%p328_p10), %s1428_s12, 7 }
  0x12   : > { %1278 = vmatprep.subr.bf16.mxu1 (!%p328_p10), %v1441_v26  ;;  %vm721_vm8 = vcmask (!%p328_p10), 1043459   ;;  %vm723_vm9 = vcmask (!%p328_p10), 1044484   ;;  %vm725_vm10 = vcmask (!%p328_p10), 1045509   ;;  %vm727_vm11 = vcmask (!%p328_p10), 1046534   ;;  %s1164_s28 = sshll.u32 (!%p328_p10), %s372_s27, 3  ;;  %s1047_s16 = scalar_lea.sflag (!%p328_p10), [#allocation4], %s372_s27 }
  0x13   : > { %v749_v33 = vsub.s32 (!%p328_p10), 0, %v748_v31  ;;  %v760_v34 = vsub.s32 (!%p328_p10), 1, %v748_v31  ;;  %v771_v35 = vsub.s32 (!%p328_p10), 2, %v748_v31  ;;  %vm781_vm2 = vcmp.ne.s32.totalorder (!%p328_p10), %v748_v31, %v779_v47 }
  0x14   : > { %vm729_vm12 = vcmask (!%p328_p10), 1047559   ;;  %vm1044_vm13 = vcmask (!%p328_p10), 523520  }
  0x16   : > { %s1556_s25 = scalar_select %p376_p11, %s1428_s12, 1 }
  0x17   : > { %s1445_s12 = smov [#allocation3]  }
  0x18   : > { %s1195_s26 = sshll.u32 %s1556_s25, 7  ;;  %s1167_s15 = sshll.u32 %s1556_s25, 3 }
  0x19   : > { %s1562_s29 = scalar_lea.vmem %s1755_s0, %s1195_s26  ;;  %s388_s20 = scalar_lea.vmem %s1756_s1, %s1167_s15 }
  0x1a   : > { %v393_v3 = vld [vmem:[%s1562_s29] sm:$0xff]  ;;  %v394_v4 = vld [vmem:[%s1562_s29 + $0x8] sm:$0xff]  ;;  %v395_v5 = vld [vmem:[%s1562_s29 + $0x10] sm:$0xff]  ;;  %s1669_s15 = scalar_lea.vmem [#allocation3], %s1164_s28  ;;  %s1705_s28 = scalar_lea.hbm %s1764_s9, %s1192_s23 }
  0x1b   : > { %1227 = vmatprep.mubr.msk.f32.mxu0 %vm417_vm0, %v393_v3  ;;  %v405_v6 = vld [vmem:[%s1562_s29 + $0x60] sm:$0xff]  ;;  %v406_v7 = vld [vmem:[%s1562_s29 + $0x68] sm:$0xff]  ;;  %v396_v8 = vld [vmem:[%s1562_s29 + $0x18] sm:$0xff] }
  0x1c   : > { %1228 = vmatmul.mubr.msk.f32.vlgmr.msra.gmra.mrb[0].mxu0 %vm417_vm0, %v394_v4  ;;  %1245 = vmatprep.mubr.msk.f32.mxu1 %vm417_vm0, %v405_v6  ;;  %v407_v9 = vld [vmem:[%s1562_s29 + $0x70] sm:$0xff]  ;;  %v397_v10 = vld [vmem:[%s1562_s29 + $0x20] sm:$0xff]  ;;  %v408_v11 = vld [vmem:[%s1562_s29 + $0x78] sm:$0xff] }
  0x1d   : > { %1230 = vmatprep.mubr.msk.f32.mxu0 %vm417_vm0, %v395_v5  ;;  %1246 = vmatmul.mubr.msk.f32.vlgmr.msra.gmra.mrb[0].mxu1 %vm417_vm0, %v406_v7  ;;  %v740_v12 = vld [vmem:[%s388_s20] sm:$0xff]  ;;  %v398_v13 = vld [vmem:[%s1562_s29 + $0x28] sm:$0xff]  ;;  %v399_v14 = vld [vmem:[%s1562_s29 + $0x30] sm:$0xff]  ;;  %s1444_s20 = smov 32  }
  0x1e   : > { %1248 = vmatprep.mubr.msk.f32.mxu1 %vm417_vm0, %v407_v9  ;;  %744 = vperm.xlu0 %1354, %v740_v12   ;;  %v400_v16 = vld [vmem:[%s1562_s29 + $0x38] sm:$0xff]  ;;  %v401_v17 = vld [vmem:[%s1562_s29 + $0x40] sm:$0xff]  ;;  %v402_v18 = vld [vmem:[%s1562_s29 + $0x48] sm:$0xff] }
  0x1f   : > { %766 = vperm.xlu1 %1356, %v740_v12   ;;  %v403_v19 = vld [vmem:[%s1562_s29 + $0x50] sm:$0xff]  ;;  %v404_v20 = vld [vmem:[%s1562_s29 + $0x58] sm:$0xff]  ;;  %1280 = vmatpush3.bf16.msra.mxu1 %v1279_v23  ;;  %s1168_s29 = sshll.u32 %s1556_s25, 2 }
  0x20   : > { %1231 = vmatmul.mubr.msk.f32.gmra.mrb[2].mxu0 %vm417_vm0, %v396_v8  ;;  %1281 = vmatprep.subr.bf16.mxu1 %v1441_v26  ;;  %s392_s24 = scalar_lea.vmem %s1757_s2, %s1168_s29  ;;  %s1362_s29 = sshll.u32 %s1445_s12, 4  ;;  %s1363_s29 = int_to_ptr.vmem [resolvable:$false] %s1362_s29 }
  0x21   : > { %1233 = vmatprep.mubr.msk.f32.mxu0 %vm417_vm0, %v397_v10  ;;  %1249 = vmatmul.mubr.msk.f32.gmra.mrb[2].mxu1 %vm417_vm0, %v408_v11  ;;  %v741_v32 = vld [vmem:[%s392_s24] sm:$0x7]  ;;  %s1060_s24 = sshll.u32 %s1669_s15, 4  ;;  %s1707_s24 = int_to_ptr.vmem [resolvable:$true] %s1060_s24 }
  0x22   : > { %1355 = vset.pattern.permute.xlu0 %v1440_v15  ;;  %1259 = vmatprep.mubr.msk.f32.mxu1 %vm1442_vm1, %v1443_v27  ;;  %v750_v38 = vrot.slane %v741_v32, %v749_v33  ;;  %v761_v39 = vrot.slane %v741_v32, %v760_v34  ;;  %v772_v40 = vrot.slane %v741_v32, %v771_v35  ;;  %s1358_s18 = scalar_lea.vmem %s1707_s24, 128  ;;  %p1365_p1 = scmp.lt.s32.totalorder %s1707_s24, %s1363_s29 }
  0x23   : > { %755 = vperm.xlu0 %1355, %v740_v12   ;;  %1283 = vmatpush3.bf16.msra.mxu1 %v1282_v28  ;;  %p1359_p12 = scmp.ne.s32.totalorder %s1707_s24, %s1358_s18 }
  0x24   : > { %1234 = vmatmul.mubr.msk.f32.gmra.mrb[4].mxu0 %vm417_vm0, %v398_v13  ;;  %1262 = vmatprep.subr.mxu1 %v1443_v27 }
  0x25   : > { %1236 = vmatprep.mubr.msk.f32.mxu0 %vm417_vm0, %v399_v14  ;;  %p1360_p13 = pnand %p1359_p12, %p1536_p4 }
  0x27   : > { %1357 = vset.pattern.permute.xlu0 %v1439_v2  ;;  %p1361_p0 = pneg %p1360_p13 }
  0x28   : > { %1237 = vmatmul.mubr.msk.f32.gmra.mrb[6].mxu0 %vm417_vm0, %v400_v16 }
  0x29   : > { %1239 = vmatprep.mubr.msk.f32.mxu0 %vm417_vm0, %v401_v17 }
  0x2c   : > { %1240 = vmatmul.mubr.msk.f32.gmra.mrb[8].mxu0 %vm417_vm0, %v402_v18 }
  0x2d   : > { %1242 = vmatprep.mubr.msk.f32.mxu0 %vm417_vm0, %v403_v19 }
  0x30   : > { %1243 = vmatmul.mubr.msk.f32.gmra.mrb[10].mxu0 %vm417_vm0, %v404_v20 }
  0x9d   : > { %v745_v30 = vpop.permute.xlu0 %744 }
  0x9e   : > { %v767_v37 = vpop.permute.xlu1 %766  ;;  %v751_v41 = vsub.f32 %v745_v30, %v750_v38 }
  0x9f   : > { %v773_v43 = vsub.f32 %v767_v37, %v772_v40 }
  0xa0   : > { %v752_v44 = vmul.f32 %v751_v41, %v751_v41 }
  0xa1   : > { %v774_v46 = vmul.f32 %v773_v43, %v773_v43 }
  0xa2   : > { %v756_v36 = vpop.permute.xlu0 %755 }
  0xa3   : > { %v762_v42 = vsub.f32 %v756_v36, %v761_v39 }
  0xa5   : > { %v763_v45 = vmul.f32 %v762_v42, %v762_v42 }
  0xa7   : > { %v764_v48 = vadd.f32 %v763_v45, %v752_v44 }
  0xa9   : > { %v775_v49 = vadd.f32 %v774_v46, %v764_v48 }
  0xab   : > { %vm780_vm3 = vcmp.le.f32.partialorder %v775_v49, 2.25 }
  0xac   : > { %vm782_vm4 = vmand %vm780_vm3, %vm781_vm2 }
  0xad   : > { %v1622_v50 = vsel %vm782_vm4, 1.0, %v1443_v27 }
  0xae   : > { %v784_v51 = vsel %vm417_vm0, %v1622_v50, 0.0 }
  0xaf   : > { %785 = vadd.xlane.f32.xlu1 %v784_v51 }
  0xef   : > { %v1229_v53 = vpop.f32.mrb[0].mxu0 }
  0xf0   : > { %v538_v54 = vadd.f32 %v1229_v53, %v1629_v52  ;;  %v532_v55 = vpop.f32.mrb[1].mxu0  ;;  %v1247_v57 = vpop.f32.mrb[0].mxu1 }
  0xf1   : > { %v533_v56 = vadd.f32 %v1629_v52, %v532_v55  ;;  %v598_v59 = vadd.f32 %v1247_v57, %v1629_v52  ;;  %v592_v60 = vpop.f32.mrb[1].mxu1 }
  0xf2   : > { %v612_v58 = vmax.f32 %v538_v54, 0.0  ;;  %v593_v63 = vadd.f32 %v1629_v52, %v592_v60 }
  0xf3   : > { %v611_v61 = vmax.f32 %v533_v56, 0.0  ;;  %v1232_v62 = vpop.f32.mrb[2].mxu0  ;;  %v624_v3 = vmax.f32 %v598_v59, 0.0 }
  0xf4   : > { %v629_v0 = vsel %vm627_vm5, %v612_v58, 0.0  ;;  %v548_v1 = vadd.f32 %v1232_v62, %v1629_v52  ;;  %v542_v2 = vpop.f32.mrb[3].mxu0  ;;  %v623_v6 = vmax.f32 %v593_v63, 0.0  ;;  %v1250_v7 = vpop.f32.mrb[2].mxu1 }
  0xf5   : > { %v628_v4 = vsel %vm627_vm5, %v611_v61, 0.0  ;;  %v543_v5 = vadd.f32 %v1629_v52, %v542_v2  ;;  %v683_v10 = vsel %vm627_vm5, %v624_v3, 0.0  ;;  %v608_v11 = vadd.f32 %v1250_v7, %v1629_v52  ;;  %v602_v12 = vpop.f32.mrb[3].mxu1 }
  0xf6   : > { %v630_v8 = vadd.f32 %v629_v0, %v628_v4  ;;  %v614_v9 = vmax.f32 %v548_v1, 0.0  ;;  %v682_v15 = vsel %vm627_vm5, %v623_v6, 0.0  ;;  %v603_v16 = vadd.f32 %v1629_v52, %v602_v12 }
  0xf7   : > { %v613_v13 = vmax.f32 %v543_v5, 0.0  ;;  %v1235_v14 = vpop.f32.mrb[4].mxu0  ;;  %v684_v21 = vadd.f32 %v683_v10, %v682_v15  ;;  %v626_v24 = vmax.f32 %v608_v11, 0.0 }
  0xf8   : > { %v631_v17 = vrot.slane %v630_v8, 4  ;;  %v638_v18 = vsel %vm627_vm5, %v614_v9, 0.0  ;;  %v558_v19 = vadd.f32 %v1235_v14, %v1629_v52  ;;  %v552_v20 = vpop.f32.mrb[5].mxu0  ;;  %v625_v25 = vmax.f32 %v603_v16, 0.0 }
  0xf9   : > { %v637_v22 = vsel %vm627_vm5, %v613_v13, 0.0  ;;  %v553_v23 = vadd.f32 %v1629_v52, %v552_v20  ;;  %v692_v33 = vsel %vm627_vm5, %v626_v24, 0.0  ;;  %v685_v56 = vrot.slane %v684_v21, 4 }
  0xfa   : > { %v632_v28 = vadd.f32 %v631_v17, %v630_v8  ;;  %v639_v29 = vadd.f32 %v638_v18, %v637_v22  ;;  %v616_v30 = vmax.f32 %v558_v19, 0.0  ;;  %v691_v34 = vsel %vm627_vm5, %v625_v25, 0.0 }
  0xfb   : > { %v615_v31 = vmax.f32 %v553_v23, 0.0  ;;  %v1238_v32 = vpop.f32.mrb[6].mxu0  ;;  %v693_v42 = vadd.f32 %v692_v33, %v691_v34  ;;  %v686_v7 = vadd.f32 %v685_v56, %v684_v21 }
  0xfc   : > { %v633_v35 = vrot.slane %v632_v28, 2  ;;  %v640_v36 = vrot.slane %v639_v29, 4  ;;  %v647_v37 = vsel %vm627_vm5, %v616_v30, 0.0  ;;  %v568_v38 = vadd.f32 %v1238_v32, %v1629_v52  ;;  %v562_v39 = vpop.f32.mrb[7].mxu0 }
  0xfd   : > { %v646_v40 = vsel %vm627_vm5, %v615_v31, 0.0  ;;  %v563_v41 = vadd.f32 %v1629_v52, %v562_v39  ;;  %v694_v0 = vrot.slane %v693_v42, 4  ;;  %v687_v30 = vrot.slane %v686_v7, 2 }
  0xfe   : > { %v634_v43 = vadd.f32 %v633_v35, %v632_v28  ;;  %v641_v44 = vadd.f32 %v640_v36, %v639_v29  ;;  %v648_v45 = vadd.f32 %v647_v37, %v646_v40  ;;  %v618_v46 = vmax.f32 %v568_v38, 0.0 }
  0xff   : > { %v617_v47 = vmax.f32 %v563_v41, 0.0  ;;  %v1241_v48 = vpop.f32.mrb[8].mxu0  ;;  %v695_v15 = vadd.f32 %v694_v0, %v693_v42  ;;  %v688_v41 = vadd.f32 %v687_v30, %v686_v7 }
 0x100   : > { %v635_v49 = vrot.slane %v634_v43, 1  ;;  %v642_v51 = vrot.slane %v641_v44, 2  ;;  %v649_v53 = vrot.slane %v648_v45, 4  ;;  %v656_v54 = vsel %vm627_vm5, %v618_v46, 0.0  ;;  %v572_v55 = vpop.f32.mrb[9].mxu0 }
 0x101   : > { %v655_v57 = vsel %vm627_vm5, %v617_v47, 0.0  ;;  %v578_v58 = vadd.f32 %v1241_v48, %v1629_v52  ;;  %v573_v1 = vadd.f32 %v1629_v52, %v572_v55  ;;  %v696_v31 = vrot.slane %v695_v15, 2 }
 0x102   : > { %v643_v59 = vadd.f32 %v642_v51, %v641_v44  ;;  %v650_v60 = vadd.f32 %v649_v53, %v648_v45  ;;  %v657_v61 = vadd.f32 %v656_v54, %v655_v57  ;;  %v636_v62 = vadd.f32 %v635_v49, %v634_v43 }
 0x103   : > { %v620_v63 = vmax.f32 %v578_v58, 0.0  ;;  %v1244_v2 = vpop.f32.mrb[10].mxu0  ;;  %v619_v9 = vmax.f32 %v573_v1, 0.0  ;;  %v697_v43 = vadd.f32 %v696_v31, %v695_v15  ;;  %v689_v49 = vrot.slane %v688_v41, 1 }
 0x104   : > { %v644_v3 = vrot.slane %v643_v59, 1  ;;  %v651_v4 = vrot.slane %v650_v60, 2  ;;  %v658_v5 = vrot.slane %v657_v61, 4  ;;  %v582_v6 = vpop.f32.mrb[11].mxu0  ;;  %v588_v13 = vadd.f32 %v1244_v2, %v1629_v52 }
 0x105   : > { %v665_v8 = vsel %vm627_vm5, %v620_v63, 0.0  ;;  %v700_v14 = vmul.f32 0.0625, %v636_v62  ;;  %v664_v16 = vsel %vm627_vm5, %v619_v9, 0.0  ;;  %v583_v17 = vadd.f32 %v1629_v52, %v582_v6  ;;  %v957_v9 = vld [vmem:[%s1762_s7 + $0x8] sm:$0xff] }
 0x106   : > { %v645_v10 = vadd.f32 %v644_v3, %v643_v59  ;;  %v652_v11 = vadd.f32 %v651_v4, %v650_v60  ;;  %v659_v12 = vadd.f32 %v658_v5, %v657_v61  ;;  %v666_v22 = vadd.f32 %v665_v8, %v664_v16  ;;  %v956_v8 = vld [vmem:[%s1762_s7] sm:$0xff] }
 0x107   : > { %v622_v21 = vmax.f32 %v588_v13, 0.0  ;;  %v621_v23 = vmax.f32 %v583_v17, 0.0  ;;  %v698_v51 = vrot.slane %v697_v43, 1  ;;  %v690_v57 = vadd.f32 %v689_v49, %v688_v41 }
 0x108   : > { %v701_v18 = vmul.f32 0.0625, %v645_v10  ;;  %v653_v19 = vrot.slane %v652_v11, 1  ;;  %v660_v20 = vrot.slane %v659_v12, 2  ;;  %v667_v29 = vrot.slane %v666_v22, 4  ;;  %v958_v10 = vld [vmem:[%s1762_s7 + $0x10] sm:$0xff] }
 0x109   : > { %v674_v32 = vsel %vm627_vm5, %v622_v21, 0.0  ;;  %v673_v33 = vsel %vm627_vm5, %v621_v23, 0.0  ;;  %v699_v58 = vadd.f32 %v698_v51, %v697_v43  ;;  %v706_v62 = vmul.f32 0.0625, %v690_v57 }
 0x10a   : > { %v718_v24 = vsel %vm717_vm6, %v701_v18, %v700_v14  ;;  %v654_v25 = vadd.f32 %v653_v19, %v652_v11  ;;  %v661_v28 = vadd.f32 %v660_v20, %v659_v12  ;;  %v668_v35 = vadd.f32 %v667_v29, %v666_v22 }
 0x10b   : > { %v675_v36 = vadd.f32 %v674_v32, %v673_v33  ;;  %v707_v63 = vmul.f32 0.0625, %v699_v58  ;;  %v868_v4 = vmul.f32 0.75, %v1622_v50  ;;  %v1285_v50 = vpack.c.bf16 %v957_v9, %v956_v8 }
 0x10c   : > { %v702_v34 = vmul.f32 0.0625, %v654_v25  ;;  %v662_v52 = vrot.slane %v661_v28, 1  ;;  %v669_v39 = vrot.slane %v668_v35, 2 }
 0x10d   : > { %v676_v40 = vrot.slane %v675_v36, 4  ;;  %v869_v5 = vsub.f32 1.0, %v868_v4 }
 0x10e   : > { %v720_v37 = vsel %vm719_vm7, %v702_v34, %v718_v24  ;;  %v663_v38 = vadd.f32 %v662_v52, %v661_v28  ;;  %v670_v44 = vadd.f32 %v669_v39, %v668_v35  ;;  %v1189_v28 = vld [vmem:[%s1763_s8] ss:$0 sm:$0xff] }
 0x10f   : > { %v677_v45 = vadd.f32 %v676_v40, %v675_v36 }
 0x110   : > { %v703_v42 = vmul.f32 0.0625, %v663_v38  ;;  %v671_v47 = vrot.slane %v670_v44, 1 }
 0x111   : > { %v678_v48 = vrot.slane %v677_v45, 2 }
 0x112   : > { %v722_v46 = vsel %vm721_vm8, %v703_v42, %v720_v37  ;;  %v672_v53 = vadd.f32 %v671_v47, %v670_v44 }
 0x113   : > { %v679_v54 = vadd.f32 %v678_v48, %v677_v45 }
 0x114   : > { %v704_v55 = vmul.f32 0.0625, %v672_v53 }
 0x115   : > { %v680_v56 = vrot.slane %v679_v54, 1 }
 0x116   : > { %v724_v59 = vsel %vm723_vm9, %v704_v55, %v722_v46 }
 0x117   : > { %v681_v60 = vadd.f32 %v680_v56, %v679_v54 }
 0x119   : > { %v705_v61 = vmul.f32 0.0625, %v681_v60 }
 0x11b   : > { %v726_v0 = vsel %vm725_vm10, %v705_v61, %v724_v59 }
 0x11c   : > { %v728_v1 = vsel %vm727_vm11, %v706_v62, %v726_v0 }
 0x11d   : > { %v730_v2 = vsel %vm729_vm12, %v707_v63, %v728_v1 }
 0x11e   : > { %733 = vst.msk [vmem:[#allocation2] sm:$0xff] %vm627_vm5, %v730_v2 }
 0x125   : > { %v738_v3 = vld [vmem:[#allocation2] sm:$0xff] }
 0x126   : > { %1260 = vmatmul.mubr.msk.f32.vlgmr.msra.gmra.mrb[4].mxu1 %vm627_vm5, %v738_v3  ;;  %739 = vst.msk [vmem:[%s1669_s15] sm:$0xff] %vm627_vm5, %v738_v3 }
 0x127   : > { %1264 = vmatprep.mubr.msk.f32.mxu1 %vm1442_vm1, %v1443_v27 }
 0x13c   : > { %v786_v12 = vpop.xlane.xlu1 %785 }
 0x13d   : > { %v864_v13 = vmul.f32 0.5, %v786_v12  ;;  %v866_v14 = vmul.f32 0.70710677, %v786_v12 }
 0x13f   : > { %v867_v15 = vmul.f32 0.70710677, %v864_v13  ;;  %v865_v16 = vsub.f32 8.0, %v864_v13 }
 0x141   : > { %v870_v17 = vadd.f32 %v867_v15, %v866_v14  ;;  %v945_v18 = vadd.f32 %v866_v14, %v865_v16 }
 0x1f9   : > { %v860_v6 = vpop.f32.mrb[4].mxu1 }
 0x1fa   : > { %v1261_v7 = vpop.f32.mrb[5].mxu1  ;;  %1263 = vmatpush3.msra.mxu1 %v860_v6  ;;  %v871_v19 = vmul.f32 %v870_v17, %v860_v6 }
 0x1fb   : > { %1265 = vmatmul.mubr.msk.f32.vlgmr.msra.gmra.mrb[6].mxu1 %vm417_vm0, %v869_v5  ;;  %1284 = vmatprep.subr.bf16.mxu1 %v1441_v26 }
 0x1fc   : > { %1275 = vmatprep.mubr.msk.f32.mxu1 %vm1442_vm1, %v1443_v27  ;;  %1286 = vmatpush3.bf16.msra.mxu1 %v1285_v50  ;;  %v959_v27 = vld [vmem:[%s1762_s7 + $0x18] sm:$0xff] }
 0x1fd   : > { %1287 = vmatprep.subr.bf16.mxu1 %v1441_v26  ;;  %v1288_v11 = vpack.c.bf16 %v959_v27, %v958_v10  ;;  %v1188_v26 = vld [vmem:[%s1761_s6] ss:$0 sm:$0xff] }
 0x1fe   : > { %v953_v21 = vmul.f32 %v1188_v26, %v945_v18 }
 0x200   : > { %1289 = vmatpush3.bf16.msra.mxu1 %v1288_v11 }
 0x2ce   : > { %v941_v20 = vpop.f32.mrb[6].mxu1 }
 0x2cf   : > { %v942_v22 = vadd.f32 %v941_v20, %v871_v19  ;;  %v1266_v23 = vpop.f32.mrb[7].mxu1 }
 0x2d1   : > { %v954_v24 = vadd.f32 %v953_v21, %v942_v22 }
 0x2d3   : > { %v955_v25 = vmul.f32 0.125, %v954_v24 }
 0x2d5   : > { %1276 = vmatmul.mubr.msk.f32.vlgmr.msra.gmra.mrb[8].mxu1 %vm627_vm5, %v955_v25 }
 0x3a8   : > { %v1036_v29 = vpop.f32.mrb[8].mxu1 }
 0x3a9   : > { %v1037_v30 = vadd.f32 %v1189_v28, %v1036_v29  ;;  %v1277_v31 = vpop.f32.mrb[9].mxu1 }
 0x3ab   : > { %1041 = vrot.lane.b32.xlu0 %v1037_v30, %s1444_s20  ;;  %s1364_s20 = scalar_lea.vmem %s1363_s29, 256 }
 0x3ac   : > { %p1366_p2 = scmp.lt.s32.totalorder %s1364_s20, %s1358_s18 }
 0x3ae   : > { %p1367_p3 = por %p1366_p2, %p1365_p1 }
 0x3b0   : > { %p1368_p5 = pnand %p1367_p3, %p1361_p0 }
 0x41d   : > { %v1042_v32 = vpop.permute.xlu0 %1041 }
 0x41e   : > { %1045 = vst.msk [vmem:[%s1669_s15] sm:$0xff] %vm1044_vm13, %v1042_v32 }
 0x41f   : > { %1371 = shalt.err (!%p1368_p5)
}
 0x420   : > { %s1372_s27 = scalar_lea.hbm %s1705_s28, 128  ;;  %s1376_s25 = scalar_lea.hbm %s1764_s9, 256 }
 0x421   : > { %p1373_p6 = scmp.ne.s32.totalorder %s1705_s28, %s1372_s27  ;;  %p1377_p10 = scmp.lt.u32.totalorder %s1705_s28, %s1764_s9 }
 0x422   : > { %p1378_p11 = scmp.lt.u32.totalorder %s1376_s25, %s1372_s27  ;;  %p1380_p13 = scmp.lt.u32.totalorder %s1372_s27, %s1705_s28 }
 0x423   : > { %p1374_p7 = pnand %p1373_p6, %p1536_p4 }
 0x424   : > { %p1379_p12 = por %p1378_p11, %p1377_p10 }
 0x425   : > { %p1375_p9 = pneg %p1374_p7 }
 0x426   : > { %p1381_p0 = por %p1380_p13, %p1379_p12 }
 0x428   : > { %p1382_p1 = pnand %p1381_p0, %p1375_p9 }
 0x42a   : > { %1385 = shalt.err (!%p1382_p1)
}
 0x42b   : > { %1292 = dma.vmem_to_hbm [thread:$0]  (%p1536_p4), %s1707_s24, 128, %s1705_s28, %s1047_s16  }
 0x42c PF: > { %p1298_p2 = scmp.ge.s32.totalorder %s1436_s14, 2  ;;  %s1072_s18 = sand.u32 1, %s1416_s30  }
 0x42d   : > { %s1073_s29 = scalar_lea.sflag [#allocation4], %s1072_s18 }
 0x42e   : > { %p1295_p3 = pnand %p1298_p2, %p1543_p8 }
 0x430   : > { %1411 = dma.done.wait (!%p1295_p3), %s1073_s29, 128  }
 0x431   : > { %1413 = vsyncadd (!%p1295_p3), %s1073_s29, 4294967168  ;;  %s22_s14 = sadd.s32 1, %s1436_s14   ;;  %s1767_s30 = smov %s1420_s10 }
 0x432   : > { %p19_p5 = scmp.ge.s32.totalorder %s22_s14, 4   ;;  %s1768_s10 = smov %s1424_s11 }
 0x433   : > { %s1769_s11 = smov %s1549_s22  ;;  %s1770_s12 = smov %s1432_s13 }
 0x434   : > { %s1771_s13 = smov %s1773_s17  ;;  %21 = sbr.rel (!%p19_p5) target bundleno = 4 (0x4), region = 102 }
 0x43b   :  { %1078 = vsyncpa [#allocation4], 1 }
 0x43c   :  { %1080 = vsyncpa [#allocation4 + $0x1], 1 }

</bundles_post_ra>
